<compile_context>
chip_gen: v5e
topology: v5e:2x2
jax: 0.10.0
libtpu: 0.0.40
codegen_flags: <defaults>
</compile_context>

<pallas_src>
import functools

import jax
import jax.numpy as jnp
from jax.experimental import pallas as pl
from jax.experimental.pallas import tpu as pltpu

Layers = [2, 50, 3]

LANE = 128      # lane width: pad hidden/output weight lanes to a multiple of this
SUBLANE = 8     # f32 sublane height
MAX_TB = 1024   # max batch-tile rows (amortizes per-grid-step overhead)


def _round_up(n, m):
    return (n + m - 1) // m * m


def mlp_kernel(x_ref, w1_ref, b1_ref, w2_ref, b2_ref, out_ref):
    # x_ref:  (tb, in_dim)        -- unpadded, in_dim is tiny (2)
    # w1_ref: (in_dim, hid_p)     -- lane-padded hidden dim
    # b1_ref: (1, hid_p)
    # w2_ref: (hid_p, out_p)      -- lane-padded output dim (extra cols are zero)
    # b2_ref: (1, out_p)
    # out_ref:(tb, out_dim)       -- narrow, unpadded output block
    x = x_ref[...]
    w1 = w1_ref[...]

    # Layer 1 as rank-1 VPU terms: avoids a K=2 MXU contraction entirely.
    h = b1_ref[...]  # (1, hid_p) broadcasts up to (tb, hid_p)
    for d in range(x_ref.shape[1]):  # static Python loop, in_dim iterations
        h = h + x[:, d:d + 1] * w1[d:d + 1, :]
    h = jnp.maximum(h, 0.0)

    # Layer 2 on the MXU, lane-dense (tb, hid_p) x (hid_p, out_p).
    out = jnp.dot(h, w2_ref[...], preferred_element_type=jnp.float32) + b2_ref[...]

    # Store only the real output columns (narrow HBM write).
    out_ref[...] = out[:, :out_ref.shape[1]].astype(out_ref.dtype)


def pad_params(w1, b1, w2, b2):
    """One-time padding of the (constant) weights to lane-dense f32 layouts."""
    in_dim, hid_dim = w1.shape
    out_dim = w2.shape[1]
    hid_p = _round_up(hid_dim, LANE)
    out_p = _round_up(out_dim, LANE)
    f32 = jnp.float32
    w1_p = jnp.zeros((in_dim, hid_p), f32).at[:, :hid_dim].set(w1.astype(f32))
    b1_p = jnp.zeros((1, hid_p), f32).at[:, :hid_dim].set(
        b1.reshape(1, hid_dim).astype(f32))
    w2_p = jnp.zeros((hid_p, out_p), f32).at[:hid_dim, :out_dim].set(w2.astype(f32))
    b2_p = jnp.zeros((1, out_p), f32).at[:, :out_dim].set(
        b2.reshape(1, out_dim).astype(f32))
    return w1_p, b1_p, w2_p, b2_p


@functools.partial(jax.jit, static_argnames=("out_dim",))
def net_forward(x, w1_p, b1_p, w2_p, b2_p, *, out_dim):
    """Forward pass matching Net(Layers=[2,50,3]).forward on pre-padded params."""
    B, in_dim = x.shape
    hid_p = w1_p.shape[1]
    out_p = w2_p.shape[1]

    # Batch tiling: balanced tile size (no huge padding for awkward B), capped
    # at MAX_TB, and >=2 grid steps whenever possible so a v7x megacore can
    # split the batch across both TensorCores.
    Br = _round_up(B, SUBLANE)
    n_tiles = pl.cdiv(Br, MAX_TB)
    if Br >= 2 * SUBLANE:
        n_tiles = max(n_tiles, 2)
    tb = _round_up(pl.cdiv(Br, n_tiles), SUBLANE)
    n_tiles = pl.cdiv(Br, tb)
    b_p = n_tiles * tb

    x = x.astype(jnp.float32)
    if b_p != B:
        x = jnp.pad(x, ((0, b_p - B), (0, 0)))  # fused under jit

    out_padded = pl.pallas_call(
        mlp_kernel,
        out_shape=jax.ShapeDtypeStruct((b_p, out_dim), jnp.float32),
        grid=(n_tiles,),
        in_specs=[
            pl.BlockSpec((tb, in_dim), lambda i: (i, 0)),     # unpadded activations
            pl.BlockSpec((in_dim, hid_p), lambda i: (0, 0)),  # weights stay VMEM-resident
            pl.BlockSpec((1, hid_p), lambda i: (0, 0)),
            pl.BlockSpec((hid_p, out_p), lambda i: (0, 0)),
            pl.BlockSpec((1, out_p), lambda i: (0, 0)),
        ],
        out_specs=pl.BlockSpec((tb, out_dim), lambda i: (i, 0)),  # narrow output block
        compiler_params=pltpu.CompilerParams(
            dimension_semantics=("parallel",),  # batch tiles split across TCs (v7x)
        ),
    )(x, w1_p, b1_p, w2_p, b2_p)

    return out_padded[:B]  # drop batch padding rows (fused under jit)


def init_params(key, layers):
    """Deterministic init mimicking PyTorch nn.Linear default U[-1/sqrt(fan_in), 1/sqrt(fan_in)]."""
    params = []
    for in_size, out_size in zip(layers, layers[1:]):
        key, kw, kb = jax.random.split(key, 3)
        bound = 1.0 / jnp.sqrt(jnp.float32(in_size))
        w = jax.random.uniform(kw, (in_size, out_size), jnp.float32, -bound, bound)
        b = jax.random.uniform(kb, (1, out_size), jnp.float32, -bound, bound)
        params.append((w, b))
    return params


if __name__ == "__main__":
    key = jax.random.PRNGKey(0)
    key, kx = jax.random.split(key)

    batch = 8
    x = jax.random.normal(kx, (batch, Layers[0]), jnp.float32)

    (w1, b1), (w2, b2) = init_params(key, Layers)

    # Padding of constant params happens once, outside the forward.
    w1_p, b1_p, w2_p, b2_p = pad_params(w1, b1, w2, b2)

    out = net_forward(x, w1_p, b1_p, w2_p, b2_p, out_dim=Layers[-1])
    out = jax.block_until_ready(out)

    # sanity check against plain-JAX reference
    ref = jnp.maximum(x @ w1 + b1, 0.0) @ w2 + b2
    assert out.shape == (batch, Layers[-1])
    assert jnp.allclose(out, ref, atol=1e-5, rtol=1e-5)

    print("KERNEL_OK")
</pallas_src>

<mosaic_0001>
module attributes {stable_mosaic.version = 11 : i64} {
  func.func @mlp_kernel(%arg0: i32, %arg1: memref<8x2xf32, #tpu.memory_space<vmem>>, %arg2: memref<2x128xf32, #tpu.memory_space<vmem>>, %arg3: memref<1x128xf32, #tpu.memory_space<vmem>>, %arg4: memref<128x128xf32, #tpu.memory_space<vmem>>, %arg5: memref<1x128xf32, #tpu.memory_space<vmem>>, %arg6: memref<8x3xf32, #tpu.memory_space<vmem>>) attributes {dimension_semantics = [#tpu.dimension_semantics<parallel>], iteration_bounds = array<i64: 1>, scalar_prefetch = 0 : i64, scratch_operands = 0 : i64, tpu.core_type = #tpu.core_type<tc>, window_params = [{transform_indices = @transform_0, window_bounds = array<i64: 8, 2>}, {pipeline_mode = #tpu.pipeline_mode<synchronous>, transform_indices = @transform_1, window_bounds = array<i64: 2, 128>}, {pipeline_mode = #tpu.pipeline_mode<synchronous>, transform_indices = @transform_2, window_bounds = array<i64: 1, 128>}, {pipeline_mode = #tpu.pipeline_mode<synchronous>, transform_indices = @transform_3, window_bounds = array<i64: 128, 128>}, {pipeline_mode = #tpu.pipeline_mode<synchronous>, transform_indices = @transform_4, window_bounds = array<i64: 1, 128>}, {transform_indices = @transform_5, window_bounds = array<i64: 8, 3>}]} {
    %c0 = arith.constant 0 : index
    %c0_0 = arith.constant 0 : index
    %0 = vector.load %arg1[%c0, %c0_0] : memref<8x2xf32, #tpu.memory_space<vmem>>, vector<8x2xf32>
    %c0_1 = arith.constant 0 : index
    %c0_2 = arith.constant 0 : index
    %1 = vector.load %arg2[%c0_1, %c0_2] : memref<2x128xf32, #tpu.memory_space<vmem>>, vector<2x128xf32>
    %c0_3 = arith.constant 0 : index
    %c0_4 = arith.constant 0 : index
    %2 = vector.load %arg3[%c0_3, %c0_4] : memref<1x128xf32, #tpu.memory_space<vmem>>, vector<1x128xf32>
    %3 = vector.extract_strided_slice %0 {offsets = [0, 0], sizes = [8, 1], strides = [1, 1]} : vector<8x2xf32> to vector<8x1xf32>
    %4 = vector.extract_strided_slice %1 {offsets = [0, 0], sizes = [1, 128], strides = [1, 1]} : vector<2x128xf32> to vector<1x128xf32>
    %5 = vector.broadcast %3 : vector<8x1xf32> to vector<8x128xf32>
    %6 = vector.broadcast %4 : vector<1x128xf32> to vector<8x128xf32>
    %7 = arith.mulf %5, %6 : vector<8x128xf32>
    %8 = vector.broadcast %2 : vector<1x128xf32> to vector<8x128xf32>
    %9 = arith.addf %8, %7 : vector<8x128xf32>
    %10 = vector.extract_strided_slice %0 {offsets = [0, 1], sizes = [8, 1], strides = [1, 1]} : vector<8x2xf32> to vector<8x1xf32>
    %11 = vector.extract_strided_slice %1 {offsets = [1, 0], sizes = [1, 128], strides = [1, 1]} : vector<2x128xf32> to vector<1x128xf32>
    %12 = vector.broadcast %10 : vector<8x1xf32> to vector<8x128xf32>
    %13 = vector.broadcast %11 : vector<1x128xf32> to vector<8x128xf32>
    %14 = arith.mulf %12, %13 : vector<8x128xf32>
    %15 = arith.addf %9, %14 : vector<8x128xf32>
    %cst = arith.constant 0.000000e+00 : f32
    %16 = vector.broadcast %cst : f32 to vector<8x128xf32>
    %17 = arith.maximumf %15, %16 : vector<8x128xf32>
    %c0_5 = arith.constant 0 : index
    %c0_6 = arith.constant 0 : index
    %18 = vector.load %arg4[%c0_5, %c0_6] : memref<128x128xf32, #tpu.memory_space<vmem>>, vector<128x128xf32>
    %cst_7 = arith.constant dense<0.000000e+00> : vector<8x128xf32>
    %19 = tpu.matmul %17, %18, %cst_7 {dimension_numbers = #tpu.dot_dimension_numbers<[1], [0], [0], [1], [0, 0, 1, 1], [], []>} : vector<8x128xf32>, vector<128x128xf32>, vector<8x128xf32> -> vector<8x128xf32>
    %c0_8 = arith.constant 0 : index
    %c0_9 = arith.constant 0 : index
    %20 = vector.load %arg5[%c0_8, %c0_9] : memref<1x128xf32, #tpu.memory_space<vmem>>, vector<1x128xf32>
    %21 = vector.broadcast %20 : vector<1x128xf32> to vector<8x128xf32>
    %22 = arith.addf %19, %21 : vector<8x128xf32>
    %23 = vector.extract_strided_slice %22 {offsets = [0, 0], sizes = [8, 3], strides = [1, 1]} : vector<8x128xf32> to vector<8x3xf32>
    %c0_10 = arith.constant 0 : index
    %c0_11 = arith.constant 0 : index
    %24 = vector.load %arg6[%c0_10, %c0_11] : memref<8x3xf32, #tpu.memory_space<vmem>>, vector<8x3xf32>
    tpu.vector_store %arg6[%c0_10, %c0_11], %23 {strides = array<i32>} : memref<8x3xf32, #tpu.memory_space<vmem>>, vector<8x3xf32>,
    return
  }
  func.func @transform_0(%arg0: i32) -> (i32, i32) {
    %c0_i32 = arith.constant 0 : i32
    %c0_i32_0 = arith.constant 0 : i32
    return %arg0, %c0_i32 : i32, i32
  }
  func.func @transform_1(%arg0: i32) -> (i32, i32) {
    %c0_i32 = arith.constant 0 : i32
    %c0_i32_0 = arith.constant 0 : i32
    %c0_i32_1 = arith.constant 0 : i32
    return %c0_i32, %c0_i32_0 : i32, i32
  }
  func.func @transform_2(%arg0: i32) -> (i32, i32) {
    %c0_i32 = arith.constant 0 : i32
    %c0_i32_0 = arith.constant 0 : i32
    %c0_i32_1 = arith.constant 0 : i32
    return %c0_i32, %c0_i32_0 : i32, i32
  }
  func.func @transform_3(%arg0: i32) -> (i32, i32) {
    %c0_i32 = arith.constant 0 : i32
    %c0_i32_0 = arith.constant 0 : i32
    %c0_i32_1 = arith.constant 0 : i32
    return %c0_i32, %c0_i32_0 : i32, i32
  }
  func.func @transform_4(%arg0: i32) -> (i32, i32) {
    %c0_i32 = arith.constant 0 : i32
    %c0_i32_0 = arith.constant 0 : i32
    %c0_i32_1 = arith.constant 0 : i32
    return %c0_i32, %c0_i32_0 : i32, i32
  }
  func.func @transform_5(%arg0: i32) -> (i32, i32) {
    %c0_i32 = arith.constant 0 : i32
    %c0_i32_0 = arith.constant 0 : i32
    return %arg0, %c0_i32 : i32, i32
  }
}

</mosaic_0001>

<bundles_post_ra>
// kernel: net_forward.1
= control target key start
LH: loop header
LB: loop body
LE: loop exit
PB: predicated region body
PF: predicated region fallthrough
CT: control target
= control target key end

     0   :  { %10 = vsyncpa [#allocation3], 0  ;;  %s140_s21 = smov [#allocation2]   ;;  %s141_s23 = smov 128   ;;  %s193_s0 = inlined_call_operand.vmem [shape: f32[8,2], index: 0, kind: input, shape index: {}]   ;;  %s194_s1 = inlined_call_operand.vmem [shape: f32[2,128], index: 1, kind: input, shape index: {}]   ;;  %s195_s2 = inlined_call_operand.vmem [shape: f32[1,128], index: 2, kind: input, shape index: {}]   ;;  %s196_s3 = inlined_call_operand.hbm [shape: f32[128,128], index: 3, kind: input, shape index: {}]   ;;  %s197_s4 = inlined_call_operand.vmem [shape: f32[1,128], index: 4, kind: input, shape index: {}]   ;;  %s198_s5 = inlined_call_operand.vmem [shape: f32[8,3], index: 5, kind: output, shape index: {}]  }
   0x1   :  { %s21_s20 = sshll.u32 %s196_s3, 4  ;;  %s23_s22 = sshll.u32 %s140_s21, 4  ;;  %s22_s20 = int_to_ptr.hbm [resolvable:$true] %s21_s20  ;;  %s24_s22 = int_to_ptr.vmem [resolvable:$true] %s23_s22 }
   0x2   :  { %s142_s24 = smov 8  }
   0x3   :  { %29 = dma.hbm_to_vmem [thread:$0]  %s22_s20, 2048, %s24_s22, [#allocation3], %s141_s23, %s141_s23, %s142_s24  }
   0x4   :  { %138 = dma.done.wait [#allocation3], 2048  }
   0x5   :  { %139 = vsyncadd [#allocation3], 4294965248  ;;  %v143_v0 = vmov 0   ;;  %v36_v1 = vld [vmem:[%s193_s0] sm:$0xff]  ;;  %v73_v2 = vld [vmem:[#allocation2 + $0x78] sm:$0xff]  ;;  %v144_v8 = vmov 1  }
   0x6   :  { %110 = vset.pattern.permute.xlu0 %v143_v0  ;;  %v72_v3 = vld [vmem:[#allocation2 + $0x70] sm:$0xff]  ;;  %78 = vmatpush.msra.mxu0 %v73_v2  ;;  %v71_v4 = vld [vmem:[#allocation2 + $0x68] sm:$0xff]  ;;  %v70_v5 = vld [vmem:[#allocation2 + $0x60] sm:$0xff]  ;;  %vm98_vm0 = vcmask 23552  }
   0x7   :  { %41 = vperm.xlu0 %110, %v36_v1   ;;  %v69_v6 = vld [vmem:[#allocation2 + $0x58] sm:$0xff]  ;;  %v68_v7 = vld [vmem:[#allocation2 + $0x50] sm:$0xff]  ;;  %v67_v9 = vld [vmem:[#allocation2 + $0x48] sm:$0xff] }
   0x8   :  { %79 = vmatpush.msra.mxu0 %v72_v3  ;;  %v66_v10 = vld [vmem:[#allocation2 + $0x40] sm:$0xff]  ;;  %v65_v11 = vld [vmem:[#allocation2 + $0x38] sm:$0xff]  ;;  %v64_v12 = vld [vmem:[#allocation2 + $0x30] sm:$0xff] }
   0x9   :  { %v63_v13 = vld [vmem:[#allocation2 + $0x28] sm:$0xff]  ;;  %v62_v14 = vld [vmem:[#allocation2 + $0x20] sm:$0xff]  ;;  %v61_v15 = vld [vmem:[#allocation2 + $0x18] sm:$0xff] }
   0xa   :  { %80 = vmatpush.msra.mxu0 %v71_v4  ;;  %v60_v16 = vld [vmem:[#allocation2 + $0x10] sm:$0xff]  ;;  %v59_v17 = vld [vmem:[#allocation2 + $0x8] sm:$0xff]  ;;  %v58_v18 = vld [vmem:[#allocation2] sm:$0xff] }
   0xb   :  { %v37_v19 = vld [vmem:[%s194_s1] sm:$0x3] }
   0xc   :  { %81 = vmatpush.msra.mxu0 %v70_v5  ;;  %v44_v21 = vperm.slane %v37_v19, 0  ;;  %v112_v22 = vld [vmem:[%s195_s2] ss:$0 sm:$0xff]  ;;  %v54_v24 = vperm.slane %v37_v19, 1 }
   0xd   :  { %v113_v30 = vld [vmem:[%s197_s4] ss:$0 sm:$0xff] }
   0xe   :  { %82 = vmatpush.msra.mxu0 %v69_v6 }
   0xf   :  { %111 = vset.pattern.permute.xlu0 %v144_v8 }
  0x10   :  { %51 = vperm.xlu0 %111, %v36_v1   ;;  %83 = vmatpush.msra.mxu0 %v68_v7 }
  0x12   :  { %84 = vmatpush.msra.mxu0 %v67_v9 }
  0x14   :  { %85 = vmatpush.msra.mxu0 %v66_v10 }
  0x16   :  { %86 = vmatpush.msra.mxu0 %v65_v11 }
  0x18   :  { %87 = vmatpush.msra.mxu0 %v64_v12 }
  0x1a   :  { %88 = vmatpush.msra.mxu0 %v63_v13 }
  0x1c   :  { %89 = vmatpush.msra.mxu0 %v62_v14 }
  0x1e   :  { %90 = vmatpush.msra.mxu0 %v61_v15 }
  0x20   :  { %91 = vmatpush.msra.mxu0 %v60_v16 }
  0x22   :  { %92 = vmatpush.msra.mxu0 %v59_v17 }
  0x24   :  { %93 = vmatpush.msra.mxu0 %v58_v18 }
  0x79   :  { %v42_v20 = vpop.permute.xlu0 %41 }
  0x7a   :  { %v45_v23 = vmul.f32 %v44_v21, %v42_v20 }
  0x7c   :  { %v49_v26 = vadd.f32 %v112_v22, %v45_v23 }
  0x82   :  { %v52_v25 = vpop.permute.xlu0 %51 }
  0x83   :  { %v55_v27 = vmul.f32 %v54_v24, %v52_v25 }
  0x85   :  { %v56_v28 = vadd.f32 %v55_v27, %v49_v26 }
  0x87   :  { %v57_v29 = vmax.f32 %v56_v28, 0.0 }
  0x89   :  { %94 = vmatmul.f32.vlgmr.msra.gmra.mxu0 %v57_v29 }
 0x106   :  { %v95_v31 = vpop.f32.mrf.mxu0 }
 0x107   :  { %v96_v32 = vadd.f32 %v113_v30, %v95_v31 }
 0x109   :  { %99 = vst.msk [vmem:[%s198_s5] sm:$0xff] %vm98_vm0, %v96_v32 }
 0x10a   :  { %104 = vsyncpa [#allocation3], 1 }

</bundles_post_ra>
